<compile_context>
chip_gen: v7x
topology: tpu7x:2x2x1
jax: 0.10.0
libtpu: 0.0.40
codegen_flags: <defaults>
</compile_context>

<pallas_src>
import functools

import jax
import jax.numpy as jnp
from jax import lax
from jax.experimental import pallas as pl
from jax.experimental.pallas import tpu as pltpu

LANE = 128


def _cdiv(a, b):
    return -(-a // b)


def _round_up(x, m):
    return _cdiv(x, m) * m


def _sublane_pack(dtype):
    # Second-minor block dim must be a multiple of the sublane packing.
    itemsize = jnp.dtype(dtype).itemsize
    return {4: 8, 2: 16, 1: 32}.get(itemsize, 8)


def _default_tuning():
    """(block_rows, num_core_splits, approx_recip) per TPU generation."""
    try:
        kind = jax.devices()[0].device_kind.lower()
    except Exception:  # pragma: no cover - defensive
        kind = ""
    if "v7" in kind:
        # 4096 rows -> 2 MiB/tile f32; 3 inputs x 2 buffers = 12 MiB (< 32 MiB
        # scoped default).  2-way split for the two TensorCores; EUP recip.
        return 4096, 2, True
    if "v6" in kind:
        return 4096, 1, False
    # v5e (16 MiB scoped default) / unknown: conservative tile, single core.
    return 2048, 1, False


def _uwl_kernel(*refs, blocks, inner, block_rows, tail_rows, base_loss,
                weighted, approx_recip):
    if weighted:
        pred_ref, targ_ref, unc_ref, acc_ref = refs
    else:
        pred_ref, targ_ref, acc_ref = refs

    c = pl.program_id(0)        # core-split axis ("parallel")
    i = pl.program_id(1)        # row-block axis ("arbitrary", accumulating)
    blk = c * inner + i         # global row-block index (may exceed blocks-1)

    # Zero this core's resident accumulator at the start of its inner loop.
    @pl.when(i == 0)
    def _():
        acc_ref[...] = jnp.zeros_like(acc_ref)

    pred = pred_ref[...].astype(jnp.float32)
    targ = targ_ref[...].astype(jnp.float32)
    diff = pred - targ
    if base_loss == 'mse':
        losses = diff * diff
    elif base_loss == 'mae':
        losses = jnp.abs(diff)
    else:
        raise ValueError(f"unsupported base_loss: {base_loss}")

    if weighted:
        unc = unc_ref[...].astype(jnp.float32)
        denom = unc + jnp.float32(1e-8)
        if approx_recip:
            # EUP reciprocal (~2^-12 rel. error, largely cancels in the final
            # ratio).  Enabled by default only on v7x where VALU time nears
            # the per-step DMA time.
            w = pl.reciprocal(denom, approx=True)
        else:
            w = 1.0 / denom
        vals = (w, losses * w)           # rows 0:8 and 8:16 of the acc block
    else:
        vals = (losses,)                 # uniform weights: only sum(losses)

    def accumulate(vs):
        # (block_rows,128) -> (block_rows//8, 8, 128), sum over the leading
        # axis: sublane-aligned reshape + pure VPU adds into a lane-parallel
        # (8,128) accumulator slice (no per-step XLU cross-lane reduce).
        for idx, v in enumerate(vs):
            acc_ref[idx * 8:(idx + 1) * 8, :] += jnp.sum(
                v.reshape(-1, 8, LANE), axis=0)

    if tail_rows < block_rows:
        # Interior blocks: fully valid, no masking work at all.
        @pl.when(blk < blocks - 1)
        def _():
            accumulate(vals)

        # Final block only: mask rows past the end of the slab.  The
        # out-of-bounds region of a partial Pallas block holds unspecified
        # data; any Inf/NaN it produces in w/losses is removed by the select
        # (jnp.where) before accumulation, so nothing propagates.
        @pl.when(blk == blocks - 1)
        def _():
            row_ids = lax.broadcasted_iota(jnp.int32, (block_rows, LANE), 0)
            mask = row_ids < tail_rows
            accumulate(tuple(jnp.where(mask, v, 0.0) for v in vals))
    else:
        # Everything divides evenly; just skip clamped duplicate blocks on
        # the last core when blocks is not a multiple of the core split.
        @pl.when(blk < blocks)
        def _():
            accumulate(vals)


def uncertainty_weighted_loss(predictions, targets, uncertainties,
                              base_loss='mse', block_rows=None,
                              num_core_splits=None, approx_recip=None):
    """Pallas-backed equivalent of UncertaintyWeightedLoss.forward."""
    if base_loss not in ('mse', 'mae'):
        raise ValueError(f"unsupported base_loss: {base_loss}")

    auto_br, auto_cores, auto_recip = _default_tuning()
    if block_rows is None:
        block_rows = auto_br
    if num_core_splits is None:
        num_core_splits = auto_cores
    if approx_recip is None:
        approx_recip = auto_recip

    full_shape = jnp.broadcast_shapes(predictions.shape, targets.shape,
                                      uncertainties.shape)
    # Scalar uncertainty: w is constant, so weights = w / mean(w) == 1 exactly
    # and the uncertainty stream never needs to touch HBM.
    weighted = int(uncertainties.size) != 1

    if predictions.shape != full_shape:
        predictions = jnp.broadcast_to(predictions, full_shape)
    if targets.shape != full_shape:
        targets = jnp.broadcast_to(targets, full_shape)
    if weighted and uncertainties.shape != full_shape:
        # TODO(synk): stream small per-channel / per-sample uncertainties via
        # SMEM scalar-prefetch (or a constant-index_map block) instead of
        # materializing a predictions-sized broadcast in HBM.
        uncertainties = jnp.broadcast_to(uncertainties, full_shape)

    n = int(predictions.size)
    if n == 0:
        return jnp.float32(jnp.nan)

    eps = jnp.float32(1e-8)
    flat_p = jnp.ravel(predictions)          # bitcast reshape, keeps dtype
    flat_t = jnp.ravel(targets)
    flat_u = jnp.ravel(uncertainties) if weighted else None

    rows = n // LANE                         # full lane-dense rows
    tail_count = n - rows * LANE             # 0..127 remainder elements

    def _losses(p, t):
        d = p.astype(jnp.float32) - t.astype(jnp.float32)
        return d * d if base_loss == 'mse' else jnp.abs(d)

    # Sub-lane remainder (< 128 elements): handled with plain jnp so the
    # kernel never needs a padded copy of the whole array.
    tail_w = jnp.float32(0.0)
    tail_lw = jnp.float32(0.0)
    tail_l = jnp.float32(0.0)
    if tail_count:
        m = rows * LANE
        tl = _losses(flat_p[m:], flat_t[m:])
        if weighted:
            tw = 1.0 / (flat_u[m:].astype(jnp.float32) + eps)
            tail_w = jnp.sum(tw)
            tail_lw = jnp.sum(tl * tw)
        else:
            tail_l = jnp.sum(tl)

    if rows > 0:
        streams = (flat_p, flat_t) + ((flat_u,) if weighted else ())
        sub = max(_sublane_pack(x.dtype) for x in streams)
        br = max(sub, min(block_rows, rows))
        br = _round_up(br, sub)              # multiple of 8 (and packing)

        blocks = _cdiv(rows, br)
        num_cores = max(1, min(num_core_splits, blocks))
        inner = _cdiv(blocks, num_cores)
        # Valid rows inside the final (possibly partial) block.
        tail_rows = rows - (blocks - 1) * br

        main = rows * LANE

        def slab(flat):
            # Aligned n: pure bitcast reshape, zero extra HBM traffic.
            # TODO(synk): for ragged n XLA may still materialize this prefix
            # slice; a fully copy-free path needs a 1D manual-DMA kernel.
            if tail_count:
                flat = flat[:main]
            return flat.reshape(rows, LANE)

        ins = tuple(slab(x) for x in streams)

        acc_rows = 16 if weighted else 8     # fused [sum_w ; sum_lw] block
        kernel = functools.partial(
            _uwl_kernel, blocks=blocks, inner=inner, block_rows=br,
            tail_rows=tail_rows, base_loss=base_loss, weighted=weighted,
            approx_recip=approx_recip)

        # Clamp so the (possibly) duplicated trailing block on the last core
        # stays in-bounds; the kernel skips its accumulation.
        in_map = lambda c, i: (jnp.minimum(c * inner + i, blocks - 1), 0)
        acc_map = lambda c, i: (c, 0)   # per-core accumulator, resident over i

        # TODO(synk): on v7x, verify via a trace that the leading axis really
        # shards across the 2 TensorCores; if not, switch to
        # dimension_semantics=(pltpu.CORE_PARALLEL, pltpu.ARBITRARY).
        acc = pl.pallas_call(
            kernel,
            out_shape=jax.ShapeDtypeStruct((num_cores * acc_rows, LANE),
                                           jnp.float32),
            grid_spec=pltpu.PrefetchScalarGridSpec(
                num_scalar_prefetch=0,
                grid=(num_cores, inner),
                in_specs=[pl.BlockSpec((br, LANE), in_map)] * len(ins),
                out_specs=pl.BlockSpec((acc_rows, LANE), acc_map),
            ),
            compiler_params=pltpu.CompilerParams(
                dimension_semantics=("parallel", "arbitrary")),
        )(*ins)

        if weighted:
            acc = acc.reshape(num_cores, 2, 8, LANE)
            sum_w = jnp.sum(acc[:, 0]) + tail_w
            sum_lw = jnp.sum(acc[:, 1]) + tail_lw
        else:
            sum_l = jnp.sum(acc) + tail_l
    else:
        # Fewer than 128 elements: everything was handled in the wrapper.
        if weighted:
            sum_w, sum_lw = tail_w, tail_lw
        else:
            sum_l = tail_l

    if weighted:
        # mean(losses * w / mean(w)): the two 1/N factors cancel.
        return sum_lw / sum_w
    # Uniform weights: plain mean of the losses.
    return sum_l / jnp.float32(n)


def _reference(predictions, targets, uncertainties, base_loss='mse'):
    eps = 1e-8
    w = 1.0 / (uncertainties + eps)
    w = w / jnp.mean(w)
    d = predictions - targets
    losses = d * d if base_loss == 'mse' else jnp.abs(d)
    return jnp.mean(losses * w)


if __name__ == "__main__":
    key = jax.random.PRNGKey(0)

    def make(shape, k, unc_shape=None):
        k1, k2, k3 = jax.random.split(k, 3)
        p = jax.random.normal(k1, shape, dtype=jnp.float32)
        t = jax.random.normal(k2, shape, dtype=jnp.float32)
        u_shape = shape if unc_shape is None else unc_shape
        u = jax.random.uniform(k3, u_shape, dtype=jnp.float32,
                               minval=0.1, maxval=1.1)
        return p, t, u

    # NCHW-shaped inputs, matching the PyTorch convention.
    cases = [
        # (shape, unc_shape, block_rows, num_core_splits)
        ((2, 4, 16, 16), None, None, None),       # auto tiling, aligned size
        ((2, 4, 16, 16), None, 8, 2),             # multi-block + core split
        ((3, 5, 17, 13), None, 8, None),          # ragged: masked final block + wrapper tail
        ((2, 4, 16, 16), (1, 1, 1, 1), 8, None),  # scalar uncertainty -> uniform weights
    ]
    keys = jax.random.split(key, len(cases))

    for (shape, unc_shape, br, ncs), k in zip(cases, keys):
        p, t, u = make(shape, k, unc_shape)
        for base_loss in ('mse', 'mae'):
            out = uncertainty_weighted_loss(p, t, u, base_loss=base_loss,
                                            block_rows=br,
                                            num_core_splits=ncs,
                                            approx_recip=False)
            out = jax.block_until_ready(out)
            ref = _reference(p, t, u, base_loss)
            assert jnp.allclose(out, ref, rtol=1e-5, atol=1e-6), (
                shape, unc_shape, br, base_loss, float(out), float(ref))

    # EUP approximate-reciprocal path (v7x default): looser tolerance.
    p, t, u = make((2, 4, 16, 16), keys[0])
    out = jax.block_until_ready(
        uncertainty_weighted_loss(p, t, u, base_loss='mse', block_rows=8,
                                  approx_recip=True))
    ref = _reference(p, t, u, 'mse')
    assert jnp.allclose(out, ref, rtol=5e-3, atol=1e-5), (float(out), float(ref))

    print("KERNEL_OK")
</pallas_src>

<mosaic_0001>
module attributes {stable_mosaic.version = 11 : i64} {
  func.func @_uwl_kernel(%arg0: i32, %arg1: i32, %arg2: memref<16x128xf32, #tpu.memory_space<vmem>>, %arg3: memref<16x128xf32, #tpu.memory_space<vmem>>, %arg4: memref<16x128xf32, #tpu.memory_space<vmem>>, %arg5: memref<16x128xf32, #tpu.memory_space<vmem>>) attributes {dimension_semantics = [#tpu.dimension_semantics<parallel>, #tpu.dimension_semantics<arbitrary>], iteration_bounds = array<i64: 1, 1>, scalar_prefetch = 0 : i64, scratch_operands = 0 : i64, tpu.core_type = #tpu.core_type<tc>, window_params = [{transform_indices = @transform_0, window_bounds = array<i64: 16, 128>}, {transform_indices = @transform_1, window_bounds = array<i64: 16, 128>}, {transform_indices = @transform_2, window_bounds = array<i64: 16, 128>}, {transform_indices = @transform_3, window_bounds = array<i64: 16, 128>}]} {
    %c1_i32 = arith.constant 1 : i32
    %0 = arith.muli %arg0, %c1_i32 : i32
    %1 = arith.addi %0, %arg1 : i32
    %c0_i32 = arith.constant 0 : i32
    %2 = arith.cmpi eq, %arg1, %c0_i32 : i32
    %3 = arith.extui %2 : i1 to i32
    %c0_i32_0 = arith.constant 0 : i32
    %4 = arith.cmpi ne, %3, %c0_i32_0 : i32
    scf.if %4 {
      %cst_9 = arith.constant 0.000000e+00 : f32
      %18 = vector.broadcast %cst_9 : f32 to vector<16x128xf32>
      %c0_10 = arith.constant 0 : index
      %c0_11 = arith.constant 0 : index
      %19 = vector.load %arg5[%c0_10, %c0_11] : memref<16x128xf32, #tpu.memory_space<vmem>>, vector<16x128xf32>
      tpu.vector_store %arg5[%c0_10, %c0_11], %18 {strides = array<i32>} : memref<16x128xf32, #tpu.memory_space<vmem>>, vector<16x128xf32>,
    } else {
    }
    %c0 = arith.constant 0 : index
    %c0_1 = arith.constant 0 : index
    %5 = vector.load %arg2[%c0, %c0_1] : memref<16x128xf32, #tpu.memory_space<vmem>>, vector<16x128xf32>
    %c0_2 = arith.constant 0 : index
    %c0_3 = arith.constant 0 : index
    %6 = vector.load %arg3[%c0_2, %c0_3] : memref<16x128xf32, #tpu.memory_space<vmem>>, vector<16x128xf32>
    %7 = arith.subf %5, %6 : vector<16x128xf32>
    %8 = arith.mulf %7, %7 : vector<16x128xf32>
    %c0_4 = arith.constant 0 : index
    %c0_5 = arith.constant 0 : index
    %9 = vector.load %arg4[%c0_4, %c0_5] : memref<16x128xf32, #tpu.memory_space<vmem>>, vector<16x128xf32>
    %cst = arith.constant 9.99999993E-9 : f32
    %10 = vector.broadcast %cst : f32 to vector<16x128xf32>
    %11 = arith.addf %9, %10 : vector<16x128xf32>
    %cst_6 = arith.constant 1.000000e+00 : f32
    %12 = vector.broadcast %cst_6 : f32 to vector<16x128xf32>
    %13 = arith.divf %12, %11 : vector<16x128xf32>
    %14 = arith.mulf %8, %13 : vector<16x128xf32>
    %c1_i32_7 = arith.constant 1 : i32
    %15 = arith.cmpi slt, %1, %c1_i32_7 : i32
    %16 = arith.extui %15 : i1 to i32
    %c0_i32_8 = arith.constant 0 : i32
    %17 = arith.cmpi ne, %16, %c0_i32_8 : i32
    scf.if %17 {
      %c0_9 = arith.constant 0 : index
      %c0_10 = arith.constant 0 : index
      %18 = vector.load %arg5[%c0_9, %c0_10] : memref<16x128xf32, #tpu.memory_space<vmem>>, vector<8x128xf32>
      %19 = vector.shape_cast %13 : vector<16x128xf32> to vector<2x8x128xf32>
      %cst_11 = arith.constant dense<0.000000e+00> : vector<8x128xf32>
      %20 = vector.multi_reduction <add>, %19, %cst_11 [0] : vector<2x8x128xf32> to vector<8x128xf32>
      %21 = arith.addf %18, %20 : vector<8x128xf32>
      %c0_12 = arith.constant 0 : index
      %c0_13 = arith.constant 0 : index
      %22 = vector.load %arg5[%c0_12, %c0_13] : memref<16x128xf32, #tpu.memory_space<vmem>>, vector<8x128xf32>
      tpu.vector_store %arg5[%c0_12, %c0_13], %21 {strides = array<i32>} : memref<16x128xf32, #tpu.memory_space<vmem>>, vector<8x128xf32>,
      %c8 = arith.constant 8 : index
      %c0_14 = arith.constant 0 : index
      %23 = vector.load %arg5[%c8, %c0_14] : memref<16x128xf32, #tpu.memory_space<vmem>>, vector<8x128xf32>
      %24 = vector.shape_cast %14 : vector<16x128xf32> to vector<2x8x128xf32>
      %cst_15 = arith.constant dense<0.000000e+00> : vector<8x128xf32>
      %25 = vector.multi_reduction <add>, %24, %cst_15 [0] : vector<2x8x128xf32> to vector<8x128xf32>
      %26 = arith.addf %23, %25 : vector<8x128xf32>
      %c8_16 = arith.constant 8 : index
      %c0_17 = arith.constant 0 : index
      %27 = vector.load %arg5[%c8_16, %c0_17] : memref<16x128xf32, #tpu.memory_space<vmem>>, vector<8x128xf32>
      tpu.vector_store %arg5[%c8_16, %c0_17], %26 {strides = array<i32>} : memref<16x128xf32, #tpu.memory_space<vmem>>, vector<8x128xf32>,
    } else {
    }
    return
  }
  func.func @transform_0(%arg0: i32, %arg1: i32) -> (i32, i32) {
    %c1_i32 = arith.constant 1 : i32
    %0 = arith.muli %arg0, %c1_i32 : i32
    %1 = arith.addi %0, %arg1 : i32
    %c0_i32 = arith.constant 0 : i32
    %2 = arith.minsi %1, %c0_i32 : i32
    %c0_i32_0 = arith.constant 0 : i32
    %c0_i32_1 = arith.constant 0 : i32
    return %2, %c0_i32_0 : i32, i32
  }
  func.func @transform_1(%arg0: i32, %arg1: i32) -> (i32, i32) {
    %c1_i32 = arith.constant 1 : i32
    %0 = arith.muli %arg0, %c1_i32 : i32
    %1 = arith.addi %0, %arg1 : i32
    %c0_i32 = arith.constant 0 : i32
    %2 = arith.minsi %1, %c0_i32 : i32
    %c0_i32_0 = arith.constant 0 : i32
    %c0_i32_1 = arith.constant 0 : i32
    return %2, %c0_i32_0 : i32, i32
  }
  func.func @transform_2(%arg0: i32, %arg1: i32) -> (i32, i32) {
    %c1_i32 = arith.constant 1 : i32
    %0 = arith.muli %arg0, %c1_i32 : i32
    %1 = arith.addi %0, %arg1 : i32
    %c0_i32 = arith.constant 0 : i32
    %2 = arith.minsi %1, %c0_i32 : i32
    %c0_i32_0 = arith.constant 0 : i32
    %c0_i32_1 = arith.constant 0 : i32
    return %2, %c0_i32_0 : i32, i32
  }
  func.func @transform_3(%arg0: i32, %arg1: i32) -> (i32, i32) {
    %c0_i32 = arith.constant 0 : i32
    %c0_i32_0 = arith.constant 0 : i32
    return %arg0, %c0_i32 : i32, i32
  }
}

</mosaic_0001>

<bundles_post_ra>
// kernel: tpu_custom_call.1
= control target key start
LH: loop header
LB: loop body
LE: loop exit
PB: predicated region body
PF: predicated region fallthrough
CT: control target
= control target key end

     0   :  { %8 = vsyncpa [#allocation3], 0  ;;  %s345_s0 = inlined_call_operand.hbm [shape: f32[16,128], index: 0, kind: input, shape index: {}]   ;;  %s346_s1 = inlined_call_operand.hbm [shape: f32[16,128], index: 1, kind: input, shape index: {}]   ;;  %s347_s2 = inlined_call_operand.hbm [shape: f32[16,128], index: 2, kind: input, shape index: {}]   ;;  %s348_s3 = inlined_call_operand.hbm [shape: f32[16,128], index: 3, kind: output, shape index: {}]  }
   0x1   :  { %9 = vsyncpa [#allocation6], 0 }
   0x2   :  { %10 = vsyncpa [#allocation4], 0  ;;  %s252_s12 = smov [#allocation5]   ;;  %s253_s14 = smov [#allocation2]  }
   0x3   :  { %s40_s13 = sshll.u32 %s252_s12, 4  ;;  %s22_s15 = sshll.u32 %s253_s14, 4  ;;  %s41_s13 = int_to_ptr.vmem [resolvable:$true] %s40_s13  ;;  %s278_s15 = int_to_ptr.vmem [resolvable:$true] %s22_s15 }
   0x4   :  { %s158_s18 = scalar_lea.hbm %s346_s1, 256 }
   0x5   :  { %p159_p0 = scmp.ne.s32.totalorder %s346_s1, %s158_s18  ;;  %p162_p1 = scmp.lt.u32.totalorder %s158_s18, %s346_s1 }
   0x7   :  { %p164_p2 = pnand %p162_p1, %p159_p0 }
   0x9   :  { %167 = shalt.err (!%p164_p2)
}
   0xa   :  { %s168_s23 = scalar_lea.vmem %s41_s13, 256  ;;  %p173_p4 = scmp.lt.s32.totalorder %s41_s13, %s41_s13 }
   0xb   :  { %p169_p3 = scmp.ne.s32.totalorder %s41_s13, %s168_s23  ;;  %p174_p5 = scmp.lt.s32.totalorder %s168_s23, %s168_s23 }
   0xd   :  { %p175_p6 = por %p174_p5, %p173_p4 }
   0xf   :  { %p176_p7 = pnand %p175_p6, %p169_p3 }
  0x11   :  { %179 = shalt.err (!%p176_p7)
}
  0x12   :  { %s254_s24 = smov 128   ;;  %s255_s25 = smov 8  }
  0x13   :  { %46 = dma.hbm_to_vmem [thread:$0]  %s346_s1, 256, %s41_s13, [#allocation6], %s254_s24, %s254_s24, %s255_s25  }
  0x14   :  { %s180_s30 = scalar_lea.hbm %s345_s0, 256 }
  0x15   :  { %p181_p8 = scmp.ne.s32.totalorder %s345_s0, %s180_s30  ;;  %p184_p9 = scmp.lt.u32.totalorder %s180_s30, %s345_s0 }
  0x17   :  { %p186_p10 = pnand %p184_p9, %p181_p8 }
  0x19   :  { %189 = shalt.err (!%p186_p10)
}
  0x1a   :  { %s190_s8 = scalar_lea.vmem %s278_s15, 256  ;;  %p195_p12 = scmp.lt.s32.totalorder %s278_s15, %s278_s15 }
  0x1b   :  { %p191_p11 = scmp.ne.s32.totalorder %s278_s15, %s190_s8  ;;  %p196_p13 = scmp.lt.s32.totalorder %s190_s8, %s190_s8 }
  0x1d   :  { %p197_p0 = por %p196_p13, %p195_p12 }
  0x1f   :  { %p198_p1 = pnand %p197_p0, %p191_p11 }
  0x21   :  { %201 = shalt.err (!%p198_p1)
}
  0x22   :  { %28 = dma.hbm_to_vmem [thread:$0]  %s345_s0, 256, %s278_s15, [#allocation3], %s254_s24, %s254_s24, %s255_s25  }
  0x23   :  { %s256_s10 = smov [#allocation7]   ;;  %s202_s14 = scalar_lea.hbm %s347_s2, 256 }
  0x24   :  { %s58_s11 = sshll.u32 %s256_s10, 4  ;;  %p203_p2 = scmp.ne.s32.totalorder %s347_s2, %s202_s14  ;;  %s59_s11 = int_to_ptr.vmem [resolvable:$true] %s58_s11 }
  0x25   :  { %p206_p3 = scmp.lt.u32.totalorder %s202_s14, %s347_s2 }
  0x27   :  { %p208_p4 = pnand %p206_p3, %p203_p2 }
  0x29   :  { %211 = shalt.err (!%p208_p4)
}
  0x2a   :  { %s212_s20 = scalar_lea.vmem %s59_s11, 256  ;;  %p217_p6 = scmp.lt.s32.totalorder %s59_s11, %s59_s11 }
  0x2b   :  { %p213_p5 = scmp.ne.s32.totalorder %s59_s11, %s212_s20  ;;  %p218_p7 = scmp.lt.s32.totalorder %s212_s20, %s212_s20 }
  0x2d   :  { %p219_p8 = por %p218_p7, %p217_p6 }
  0x2f   :  { %p220_p9 = pnand %p219_p8, %p213_p5 }
  0x31   :  { %223 = shalt.err (!%p220_p9)
}
  0x32   :  { %64 = dma.hbm_to_vmem [thread:$0]  %s347_s2, 256, %s59_s11, [#allocation6], %s254_s24, %s254_s24, %s255_s25  }
  0x33   :  { %246 = dma.done.wait [#allocation3], 256  }
  0x34   :  { %247 = vsyncadd [#allocation3], 4294967040 }
  0x35   :  { %248 = dma.done.wait [#allocation6], 512  }
  0x36   :  { %249 = vsyncadd [#allocation6], 4294966784  ;;  %v101_v0 = vld [vmem:[#allocation7] sm:$0xff]  ;;  %v102_v1 = vld [vmem:[#allocation7 + $0x8] sm:$0xff]  ;;  %s257_s2 = smov [#allocation8]  }
  0x37   :  { %v103_v2 = vadd.f32 1e-08, %v101_v0  ;;  %v104_v3 = vadd.f32 1e-08, %v102_v1  ;;  %v93_v4 = vld [vmem:[#allocation2] sm:$0xff]  ;;  %v95_v5 = vld [vmem:[#allocation5] sm:$0xff] }
  0x38   :  { %v94_v6 = vld [vmem:[#allocation2 + $0x8] sm:$0xff]  ;;  %v96_v7 = vld [vmem:[#allocation5 + $0x8] sm:$0xff]  ;;  %v97_v8 = vsub.f32 %v93_v4, %v95_v5  ;;  %s128_s21 = sshll.u32 %s257_s2, 4  ;;  %s129_s21 = int_to_ptr.vmem [resolvable:$true] %s128_s21 }
  0x39   :  { %154 = vrcp.f32 %v103_v2  ;;  %v98_v9 = vsub.f32 %v94_v6, %v96_v7  ;;  %s224_s22 = scalar_lea.vmem %s129_s21, 256  ;;  %p229_p11 = scmp.lt.s32.totalorder %s129_s21, %s129_s21 }
  0x3a   :  { %156 = vrcp.f32 %v104_v3  ;;  %v99_v10 = vmul.f32 %v97_v8, %v97_v8  ;;  %p225_p10 = scmp.ne.s32.totalorder %s129_s21, %s224_s22  ;;  %p230_p12 = scmp.lt.s32.totalorder %s224_s22, %s224_s22 }
  0x3b   :  { %v100_v11 = vmul.f32 %v98_v9, %v98_v9 }
  0x3c   :  { %p231_p13 = por %p230_p12, %p229_p11 }
  0x3e   :  { %p232_p0 = pnand %p231_p13, %p225_p10 }
  0x43   :  { %v155_v12 = vpop.eup %154 }
  0x44   :  { %v157_v13 = vpop.eup %156  ;;  %v109_v14 = vmul.f32 %v155_v12, %v99_v10 }
  0x45   :  { %v116_v15 = vadd.f32 %v157_v13, %v155_v12  ;;  %v110_v16 = vmul.f32 %v157_v13, %v100_v11 }
  0x47   :  { %v120_v17 = vadd.f32 %v110_v16, %v109_v14  ;;  %118 = vst [vmem:[#allocation8] sm:$0xff] %v116_v15 }
  0x49   :  { %122 = vst [vmem:[#allocation8 + $0x8] sm:$0xff] %v120_v17 }
  0x4a   :  { %235 = shalt.err (!%p232_p0)
}
  0x4b   :  { %s236_s27 = scalar_lea.hbm %s348_s3, 256 }
  0x4c   :  { %p237_p1 = scmp.ne.s32.totalorder %s348_s3, %s236_s27  ;;  %p240_p2 = scmp.lt.u32.totalorder %s236_s27, %s348_s3 }
  0x4e   :  { %p242_p3 = pnand %p240_p2, %p237_p1 }
  0x50   :  { %245 = shalt.err (!%p242_p3)
}
  0x51   :  { %134 = dma.vmem_to_hbm [thread:$0]  %s129_s21, 256, %s348_s3, [#allocation4], %s254_s24, %s254_s24, %s255_s25  }
  0x52   :  { %250 = dma.done.wait [#allocation4], 256  }
  0x53   :  { %251 = vsyncadd [#allocation4], 4294967040 }
  0x54   :  { %138 = vsyncpa [#allocation3], 1 }
  0x55   :  { %139 = vsyncpa [#allocation6], 1 }
  0x56   :  { %140 = vsyncpa [#allocation4], 1 }

</bundles_post_ra>
